<compile_context>
chip_gen: v5e
topology: v5e:2x2
jax: 0.10.0
libtpu: 0.0.40
codegen_flags: <defaults>
</compile_context>

<pallas_src>
import functools

import jax
import jax.numpy as jnp
from jax.experimental import pallas as pl
from jax.experimental.pallas import tpu as pltpu


def _net_kernel(edge_ref, out_ref, *, value: int):
    # edge_ref : HBM (ANY) [2, E] int32 -- kept only to mirror forward(edge_index);
    #            the PyTorch module never reads its values, so neither do we
    #            (no DMA, no reduction).
    # out_ref  : SMEM (1,) int32        -- the returned constant (30 or 50).
    del edge_ref  # intentionally unused: no data is read from edge_index
    out_ref[0] = jnp.int32(value)


def net_forward(edge_index: jax.Array, is_sparse: bool = False) -> jax.Array:
    """Equivalent of Net()(edge_index): returns int32 scalar 30 or 50.

    `is_sparse` stands in for `isinstance(edge_index, SparseTensor)`; since it
    is a Python bool, the dispatch is resolved at trace time and the kernel
    just materializes the selected constant.
    """
    value = 30 if is_sparse else 50  # trace-time type dispatch

    out = pl.pallas_call(
        functools.partial(_net_kernel, value=value),
        out_shape=jax.ShapeDtypeStruct((1,), jnp.int32),
        in_specs=[
            # Leave edge_index in place (HBM); no BlockSpec tiling, no DMA.
            pl.BlockSpec(memory_space=pl.ANY),
        ],
        out_specs=pl.BlockSpec(memory_space=pltpu.MemorySpace.SMEM),
    )(edge_index)
    return out[0]


if __name__ == "__main__":
    key = jax.random.PRNGKey(0)
    # Small edge_index: [2, E] with E = 8 (8 edges over 8 nodes), int32.
    edge_index = jax.random.randint(key, (2, 8), 0, 8, dtype=jnp.int32)

    # Dense Tensor path -> 50
    dense_out = jax.block_until_ready(net_forward(edge_index, is_sparse=False))
    # SparseTensor path (flag-encoded) -> 30
    sparse_out = jax.block_until_ready(net_forward(edge_index, is_sparse=True))

    assert int(dense_out) == 50, f"expected 50, got {int(dense_out)}"
    assert int(sparse_out) == 30, f"expected 30, got {int(sparse_out)}"
    print("KERNEL_OK")
</pallas_src>

<mosaic_0001>
module attributes {stable_mosaic.version = 11 : i64} {
  func.func @_net_kernel(%arg0: memref<2x8xi32, #tpu.memory_space<any>>, %arg1: memref<1xi32, #tpu.memory_space<smem>>) attributes {dimension_semantics = [], scalar_prefetch = 0 : i64, scratch_operands = 0 : i64, tpu.core_type = #tpu.core_type<tc>} {
    %c50_i32 = arith.constant 50 : i32
    %c0 = arith.constant 0 : index
    %0 = memref.load %arg1[%c0] : memref<1xi32, #tpu.memory_space<smem>>
    memref.store %c50_i32, %arg1[%c0] : memref<1xi32, #tpu.memory_space<smem>>
    return
  }
}

</mosaic_0001>

<bundles_post_ra>
// kernel: tpu_custom_call.1
= control target key start
LH: loop header
LB: loop body
LE: loop exit
PB: predicated region body
PF: predicated region fallthrough
CT: control target
= control target key end

     0   :  { %6 = vsyncpa [#allocation3], 0  ;;  %s40_s9 = smov 50   ;;  %s41_s10 = smov [#allocation2]   ;;  %s55_s0 = inlined_call_operand.hbm [shape: s32[2,8], index: 0, kind: input, shape index: {}]   ;;  %s56_s1 = inlined_call_operand.hbm [shape: s32[1], index: 1, kind: output, shape index: {}]  }
   0x1   :  { %s14_s8 = sshll.u32 %s56_s1, 4  ;;  %8 = sst [smem:[#allocation2]] %s40_s9  ;;  %s15_s8 = int_to_ptr.hbm [resolvable:$true] %s14_s8 }
   0x2   :  { %17 = dma.smem_to_hbm %s41_s10, 16, %s15_s8, [#allocation3]  }
   0x3   :  { %38 = dma.done.wait [#allocation3], 16  }
   0x4   :  { %39 = vsyncadd [#allocation3], 4294967280 }
   0x5   :  { %22 = sfence }
   0x6   :  { %23 = vsyncpa [#allocation3], 1 }

</bundles_post_ra>
